<compile_context>
chip_gen: v6e
topology: v6e:2x2x1
jax: 0.10.0
libtpu: 0.0.40
codegen_flags: <defaults>
</compile_context>

<pallas_src>
import numpy as np
import jax
import jax.numpy as jnp
from jax import lax
from jax.experimental import pallas as pl
from jax.experimental.pallas import tpu as pltpu


def _round_up(n, m):
    return ((n + m - 1) // m) * m


# --------------------------------------------------------------------------- #
# Kernel: one (direction, batch, L-chunk) grid point.
# --------------------------------------------------------------------------- #
def _bilru_kernel(x_ref, wi_ref, bi_ref, lpr_ref, lpi_ref, wo_ref, bo_ref,
                  o_ref, ur_s, ui_s, cr_s, ci_s):
    c = pl.program_id(2)                       # L-chunk index ("arbitrary" axis)
    TL, Hp = ur_s.shape                        # chunk length (power of 2), padded channels
    n_pass = int(TL).bit_length() - 1          # log2(TL) doubling passes

    # Reset the carried complex recurrence state at the first chunk of each (dir, b).
    @pl.when(c == 0)
    def _():
        cr_s[...] = jnp.zeros_like(cr_s)
        ci_s[...] = jnp.zeros_like(ci_s)

    # ---- fused i_dense: one (TL,Dp)@(Dp,2Hp) bf16 MXU pass, f32 accumulate ------
    x = x_ref[0, 0]                                                    # (TL, Dp) bf16
    u = jnp.dot(x, wi_ref[0], preferred_element_type=jnp.float32) + bi_ref[0]
    ur_s[...] = u[:, :Hp]                                              # Re(u)
    ui_s[...] = u[:, Hp:]                                              # Im(u)

    # ---- fold the cross-chunk carry into row 0:  u'_0 = u_0 + lambda * carry ----
    lr1 = lpr_ref[0, pl.ds(0, 1), :]                                   # (1,Hp) Re(lambda)
    li1 = lpi_ref[0, pl.ds(0, 1), :]                                   # (1,Hp) Im(lambda)
    cr = cr_s[...]                                                     # (1,Hp)
    ci = ci_s[...]
    r0 = ur_s[pl.ds(0, 1), :]
    i0 = ui_s[pl.ds(0, 1), :]
    ur_s[pl.ds(0, 1), :] = r0 + lr1 * cr - li1 * ci
    ui_s[pl.ds(0, 1), :] = i0 + lr1 * ci + li1 * cr

    # ---- within-chunk scan: log2(TL) Hillis-Steele doubling passes --------------
    #   s[j] += lambda**d * s[j-d]   for j >= d,  d = 1, 2, 4, ..., TL/2
    # lpr/lpi row k holds lambda**(2**k) per channel (padded lanes are 0).
    # Full-window read-before-write ordering is required for in-place correctness.
    for k in range(n_pass):
        d = 1 << k
        ar = lpr_ref[0, pl.ds(k, 1), :]                                # (1,Hp) Re(lambda**d)
        ai = lpi_ref[0, pl.ds(k, 1), :]                                # (1,Hp) Im(lambda**d)
        lo_r = ur_s[pl.ds(0, TL - d), :]
        lo_i = ui_s[pl.ds(0, TL - d), :]
        hi_r = ur_s[pl.ds(d, TL - d), :]
        hi_i = ui_s[pl.ds(d, TL - d), :]
        ur_s[pl.ds(d, TL - d), :] = hi_r + ar * lo_r - ai * lo_i
        ui_s[pl.ds(d, TL - d), :] = hi_i + ar * lo_i + ai * lo_r

    # ---- carry for the next chunk is simply the last row of the scanned state ---
    cr_s[...] = ur_s[pl.ds(TL - 1, 1), :]
    ci_s[...] = ui_s[pl.ds(TL - 1, 1), :]

    # ---- o_dense (gamma pre-folded into the weights), split K=Hp matmuls, relu ---
    sr = ur_s[...].astype(jnp.bfloat16)                                # (TL, Hp) bf16
    si = ui_s[...].astype(jnp.bfloat16)
    z = (jnp.dot(sr, wo_ref[0, pl.ds(0, Hp), :], preferred_element_type=jnp.float32)
         + jnp.dot(si, wo_ref[0, pl.ds(Hp, Hp), :], preferred_element_type=jnp.float32)
         + bo_ref[0])
    o_ref[0, 0] = jnp.maximum(z, 0.0).astype(o_ref.dtype)              # relu; dropout = id


# --------------------------------------------------------------------------- #
# Wrapper
# --------------------------------------------------------------------------- #
def bidirectional_lru_forward(x, params, *, tl=None):
    """x: (B, L, D) float32.  params: {"fwd": cell, "bwd": cell} (see init_params)."""
    B, L, D = x.shape
    Hp = _round_up(max(D, 128), 128)          # padded channel count (lane-dense)
    Dp = Hp                                   # i_dense input width (== D, padded)
    if tl is None:
        cap = 512 if Hp <= 256 else 256       # bigger chunks amortize per-step overhead
        tl = max(8, min(cap, pl.next_power_of_2(L)))
    TL = int(tl)
    assert TL >= 8 and (TL & (TL - 1)) == 0, "chunk length must be a power of two >= 8"
    Lp = _round_up(L, TL)
    nc = Lp // TL
    n_pass = TL.bit_length() - 1              # number of doubling passes
    n_rows = _round_up(max(n_pass, 1), 8)     # lambda-power table rows (sublane-padded)

    # ---- parameter packing / padding (plumbing only, no per-token compute) ------
    def pack_cell(p):
        wi, bi, wo, bo = p["wi"], p["bi"], p["wo"], p["bo"]
        # i_dense: even output rows -> real plane, odd -> imag (torch.view_as_complex)
        wi_f = jnp.concatenate(
            [jnp.pad(wi[0::2, :].T, ((0, Dp - D), (0, Hp - D))),
             jnp.pad(wi[1::2, :].T, ((0, Dp - D), (0, Hp - D)))], axis=1)     # (Dp, 2Hp)
        bi_f = jnp.concatenate(
            [jnp.pad(bi[0::2], (0, Hp - D)),
             jnp.pad(bi[1::2], (0, Hp - D))])[None, :]                        # (1, 2Hp)
        # lambda-power table: row k holds lambda**(2**k); row 0 (= lambda) also injects
        # the cross-chunk carry. Only log2(TL) rows are needed (carry is folded in).
        e = jnp.asarray(2.0 ** np.arange(n_pass), dtype=jnp.float32)[:, None] # (n_pass,1)
        mag = jnp.exp(-e * p["v"][None, :])
        ang = e * p["theta"][None, :]
        lam_r = jnp.pad(mag * jnp.cos(ang), ((0, n_rows - n_pass), (0, Hp - D)))
        lam_i = jnp.pad(mag * jnp.sin(ang), ((0, n_rows - n_pass), (0, Hp - D)))
        # o_dense on cat([Re, Im], -1) with gamma folded into the rows:
        #   [Re||Im]*g @ Wo^T  ==  [Re||Im] @ (diag(g,g) Wo^T)
        wo_t = wo.T * jnp.concatenate([p["gamma"], p["gamma"]])[:, None]      # (2D, D)
        wo_f = jnp.concatenate(
            [jnp.pad(wo_t[:D], ((0, Hp - D), (0, Hp - D))),
             jnp.pad(wo_t[D:], ((0, Hp - D), (0, Hp - D)))], axis=0)          # (2Hp, Hp)
        bo_f = jnp.pad(bo, (0, Hp - D))[None, :]                              # (1, Hp)
        return wi_f, bi_f, lam_r, lam_i, wo_f, bo_f

    pf, pb = pack_cell(params["fwd"]), pack_cell(params["bwd"])
    wi_f, bi_f, lam_r, lam_i, wo_f, bo_f = (
        jnp.stack([a, b], axis=0) for a, b in zip(pf, pb))
    wi_f = wi_f.astype(jnp.bfloat16)          # MXU operands in bf16 (f32 accumulate)
    wo_f = wo_f.astype(jnp.bfloat16)

    # Both directions run as forward scans: flip the backward input here (and flip its
    # output back below), exactly like torch.flip in the PyTorch module. Padded time
    # rows sit at the END of both streams, so they never corrupt the carried state.
    x2 = jnp.stack([x, jnp.flip(x, axis=1)], axis=0)                          # (2,B,L,D)
    x2 = jnp.pad(x2, ((0, 0), (0, 0), (0, Lp - L), (0, Dp - D))).astype(jnp.bfloat16)

    # ---- VMEM budget: double-buffered blocks + scratch + value temporaries ------
    blk = (2 * TL * Dp * 2 + 2 * TL * Hp * 2            # x / out blocks (bf16, 2 bufs)
           + 2 * (Dp * 2 * Hp) * 2 + 2 * (2 * Hp) * 4   # wi (bf16) / bi (f32), 2 bufs
           + 2 * (2 * n_rows * Hp) * 4                  # lambda tables (f32), 2 bufs
           + 2 * (2 * Hp * Hp) * 2 + 2 * Hp * 4         # wo (bf16) / bo (f32), 2 bufs
           + 2 * TL * Hp * 4 + 2 * Hp * 4)              # state + carry scratch (f32)
    tmp = TL * 2 * Hp * 4 + 2 * TL * Hp * 2 + TL * Hp * 4   # u, sr/si (bf16), z values
    try:   # generation-aware ceiling: ~72% of physical VMEM, never above 56 MiB
        cap_bytes = int(getattr(pltpu.get_tpu_info(), "vmem_capacity_bytes", 128 << 20))
    except Exception:
        cap_bytes = 64 << 20                  # conservative (v7x-sized) fallback
    ceiling = min(56 << 20, int(0.72 * cap_bytes))
    vmem_limit = int(min(max(blk + tmp + (4 << 20), 16 << 20), ceiling))

    out = pl.pallas_call(
        _bilru_kernel,
        out_shape=jax.ShapeDtypeStruct((2, B, Lp, Hp), jnp.bfloat16),
        grid_spec=pltpu.PrefetchScalarGridSpec(
            num_scalar_prefetch=0,
            grid=(2, B, nc),                  # direction outermost: weights stay resident
            in_specs=[
                pl.BlockSpec((1, 1, TL, Dp), lambda d, b, c: (d, b, c, 0)),   # x chunk
                pl.BlockSpec((1, Dp, 2 * Hp), lambda d, b, c: (d, 0, 0)),     # i_dense W
                pl.BlockSpec((1, 1, 2 * Hp), lambda d, b, c: (d, 0, 0)),      # i_dense b
                pl.BlockSpec((1, n_rows, Hp), lambda d, b, c: (d, 0, 0)),     # Re(lambda^2^k)
                pl.BlockSpec((1, n_rows, Hp), lambda d, b, c: (d, 0, 0)),     # Im(lambda^2^k)
                pl.BlockSpec((1, 2 * Hp, Hp), lambda d, b, c: (d, 0, 0)),     # o_dense W (gamma-folded)
                pl.BlockSpec((1, 1, Hp), lambda d, b, c: (d, 0, 0)),          # o_dense b
            ],
            out_specs=pl.BlockSpec((1, 1, TL, Hp), lambda d, b, c: (d, b, c, 0)),
            scratch_shapes=[pltpu.VMEM((TL, Hp), jnp.float32),   # Re(state) plane
                            pltpu.VMEM((TL, Hp), jnp.float32),   # Im(state) plane
                            pltpu.VMEM((1, Hp), jnp.float32),    # Re(carry)
                            pltpu.VMEM((1, Hp), jnp.float32)],   # Im(carry)
        ),
        compiler_params=pltpu.CompilerParams(
            dimension_semantics=("parallel", "parallel", "arbitrary"),
            vmem_limit_bytes=vmem_limit),
    )(x2, wi_f, bi_f, lam_r, lam_i, wo_f, bo_f)

    fwd = out[0, :, :L, :D]
    bwd = jnp.flip(out[1, :, :L, :D], axis=1)
    return jnp.concatenate([fwd, bwd], axis=-1).astype(jnp.float32)           # (B, L, 2D)


# --------------------------------------------------------------------------- #
# Parameter init (mirrors the PyTorch module's __init__) and pure-JAX reference.
# --------------------------------------------------------------------------- #
def init_params(key, in_features, r_min=0.9, r_max=0.999):
    D = in_features

    def one_cell(k):
        ks = jax.random.split(k, 4)

        def linear(kk, fan_in, fan_out):
            bound = 1.0 / np.sqrt(fan_in)
            kw, kb = jax.random.split(kk)
            w = jax.random.uniform(kw, (fan_out, fan_in), jnp.float32, -bound, bound)
            b = jax.random.uniform(kb, (fan_out,), jnp.float32, -bound, bound)
            return w, b

        wi, bi = linear(ks[0], D, 2 * D)          # i_dense
        wo, bo = linear(ks[1], 2 * D, D)          # o_dense
        u1 = jax.random.uniform(ks[2], (D,), jnp.float32)
        u2 = jax.random.uniform(ks[3], (D,), jnp.float32)
        v = -0.5 * jnp.log(u1 * (r_max ** 2 - r_min ** 2) + r_min ** 2)   # exp(v_log)
        theta = u2 * 2.0 * np.pi                                          # exp(theta_log)
        gamma = jnp.sqrt(1.0 - jnp.exp(-v) ** 2)                          # exp(gamma_log)
        return {"wi": wi, "bi": bi, "wo": wo, "bo": bo,
                "v": v, "theta": theta, "gamma": gamma}

    kf, kb = jax.random.split(key)
    return {"fwd": one_cell(kf), "bwd": one_cell(kb)}


def _lru_cell_reference(x, p):
    """Pure-JAX per-cell reference (sequential scan), used only for the self-check."""
    u = x @ p["wi"].T + p["bi"]
    ur, ui = u[..., 0::2], u[..., 1::2]
    lam_r = jnp.exp(-p["v"]) * jnp.cos(p["theta"])
    lam_i = jnp.exp(-p["v"]) * jnp.sin(p["theta"])
    B, _, D = ur.shape

    def step(carry, u_t):
        sr, si = carry
        nr = lam_r * sr - lam_i * si + u_t[0]
        ni = lam_r * si + lam_i * sr + u_t[1]
        return (nr, ni), (nr, ni)

    init = (jnp.zeros((B, D)), jnp.zeros((B, D)))
    _, (sr, si) = lax.scan(step, init, (ur.transpose(1, 0, 2), ui.transpose(1, 0, 2)))
    sr = sr.transpose(1, 0, 2) * p["gamma"]
    si = si.transpose(1, 0, 2) * p["gamma"]
    z = jnp.concatenate([sr, si], axis=-1) @ p["wo"].T + p["bo"]
    return jnp.maximum(z, 0.0)


def bidirectional_lru_reference(x, params):
    f = _lru_cell_reference(x, params["fwd"])
    b = jnp.flip(_lru_cell_reference(jnp.flip(x, axis=1), params["bwd"]), axis=1)
    return jnp.concatenate([f, b], axis=-1)


if __name__ == "__main__":
    key = jax.random.PRNGKey(0)
    kx1, kp1, kx2, kp2 = jax.random.split(key, 4)

    # Config 1: batch=2, seq=8, in_features=32  (single chunk per direction).
    B, L, D = 2, 8, 32
    x = jax.random.normal(kx1, (B, L, D), jnp.float32)
    params = init_params(kp1, D)
    out = jax.block_until_ready(bidirectional_lru_forward(x, params))
    ref = bidirectional_lru_reference(x, params)
    assert out.shape == (B, L, 2 * D)
    np.testing.assert_allclose(np.asarray(out), np.asarray(ref), rtol=2e-2, atol=2e-2)

    # Config 2: exercises time padding, channel padding and the cross-chunk carry fold
    # (L=20 -> Lp=24 with TL=8, i.e. three chunks per direction).
    B2, L2, D2 = 1, 20, 24
    x2 = jax.random.normal(kx2, (B2, L2, D2), jnp.float32)
    params2 = init_params(kp2, D2)
    out2 = jax.block_until_ready(bidirectional_lru_forward(x2, params2, tl=8))
    ref2 = bidirectional_lru_reference(x2, params2)
    assert out2.shape == (B2, L2, 2 * D2)
    np.testing.assert_allclose(np.asarray(out2), np.asarray(ref2), rtol=2e-2, atol=2e-2)

    print("KERNEL_OK")
</pallas_src>

<mosaic_0001>
module attributes {stable_mosaic.version = 11 : i64} {
  func.func @_bilru_kernel(%arg0: i32, %arg1: i32, %arg2: i32, %arg3: memref<1x1x8x128xbf16, #tpu.memory_space<vmem>>, %arg4: memref<1x128x256xbf16, #tpu.memory_space<vmem>>, %arg5: memref<1x1x256xf32, #tpu.memory_space<vmem>>, %arg6: memref<1x8x128xf32, #tpu.memory_space<vmem>>, %arg7: memref<1x8x128xf32, #tpu.memory_space<vmem>>, %arg8: memref<1x256x128xbf16, #tpu.memory_space<vmem>>, %arg9: memref<1x1x128xf32, #tpu.memory_space<vmem>>, %arg10: memref<1x1x8x128xbf16, #tpu.memory_space<vmem>>, %arg11: memref<8x128xf32, #tpu.memory_space<vmem>>, %arg12: memref<8x128xf32, #tpu.memory_space<vmem>>, %arg13: memref<1x128xf32, #tpu.memory_space<vmem>>, %arg14: memref<1x128xf32, #tpu.memory_space<vmem>>) attributes {dimension_semantics = [#tpu.dimension_semantics<parallel>, #tpu.dimension_semantics<parallel>, #tpu.dimension_semantics<arbitrary>], iteration_bounds = array<i64: 2, 2, 1>, scalar_prefetch = 0 : i64, scratch_operands = 4 : i64, tpu.core_type = #tpu.core_type<tc>, window_params = [{transform_indices = @transform_0, window_bounds = array<i64: 1, 1, 8, 128>}, {transform_indices = @transform_1, window_bounds = array<i64: 1, 128, 256>}, {transform_indices = @transform_2, window_bounds = array<i64: 1, 1, 256>}, {transform_indices = @transform_3, window_bounds = array<i64: 1, 8, 128>}, {transform_indices = @transform_4, window_bounds = array<i64: 1, 8, 128>}, {transform_indices = @transform_5, window_bounds = array<i64: 1, 256, 128>}, {transform_indices = @transform_6, window_bounds = array<i64: 1, 1, 128>}, {transform_indices = @transform_7, window_bounds = array<i64: 1, 1, 8, 128>}]} {
    %c0_i32 = arith.constant 0 : i32
    %0 = arith.cmpi eq, %arg2, %c0_i32 : i32
    %1 = arith.extui %0 : i1 to i32
    %c0_i32_0 = arith.constant 0 : i32
    %2 = arith.cmpi ne, %1, %c0_i32_0 : i32
    scf.if %2 {
      %cst_109 = arith.constant 0.000000e+00 : f32
      %125 = vector.broadcast %cst_109 : f32 to vector<1x128xf32>
      %c0_110 = arith.constant 0 : index
      %c0_111 = arith.constant 0 : index
      %126 = vector.load %arg13[%c0_110, %c0_111] : memref<1x128xf32, #tpu.memory_space<vmem>>, vector<1x128xf32>
      tpu.vector_store %arg13[%c0_110, %c0_111], %125 {strides = array<i32>} : memref<1x128xf32, #tpu.memory_space<vmem>>, vector<1x128xf32>,
      %cst_112 = arith.constant 0.000000e+00 : f32
      %127 = vector.broadcast %cst_112 : f32 to vector<1x128xf32>
      %c0_113 = arith.constant 0 : index
      %c0_114 = arith.constant 0 : index
      %128 = vector.load %arg14[%c0_113, %c0_114] : memref<1x128xf32, #tpu.memory_space<vmem>>, vector<1x128xf32>
      tpu.vector_store %arg14[%c0_113, %c0_114], %127 {strides = array<i32>} : memref<1x128xf32, #tpu.memory_space<vmem>>, vector<1x128xf32>,
    } else {
    }
    %c0 = arith.constant 0 : index
    %c0_1 = arith.constant 0 : index
    %c0_2 = arith.constant 0 : index
    %c0_3 = arith.constant 0 : index
    %3 = vector.load %arg3[%c0, %c0_1, %c0_2, %c0_3] : memref<1x1x8x128xbf16, #tpu.memory_space<vmem>>, vector<1x1x8x128xbf16>
    %4 = vector.shape_cast %3 : vector<1x1x8x128xbf16> to vector<8x128xbf16>
    %c0_4 = arith.constant 0 : index
    %c0_5 = arith.constant 0 : index
    %c0_6 = arith.constant 0 : index
    %5 = vector.load %arg4[%c0_4, %c0_5, %c0_6] : memref<1x128x256xbf16, #tpu.memory_space<vmem>>, vector<1x128x256xbf16>
    %6 = vector.shape_cast %5 : vector<1x128x256xbf16> to vector<128x256xbf16>
    %cst = arith.constant dense<0.000000e+00> : vector<8x256xf32>
    %7 = tpu.matmul %4, %6, %cst {dimension_numbers = #tpu.dot_dimension_numbers<[1], [0], [0], [1], [0, 0, 1, 1], [], []>} : vector<8x128xbf16>, vector<128x256xbf16>, vector<8x256xf32> -> vector<8x256xf32>
    %c0_7 = arith.constant 0 : index
    %c0_8 = arith.constant 0 : index
    %c0_9 = arith.constant 0 : index
    %8 = vector.load %arg5[%c0_7, %c0_8, %c0_9] : memref<1x1x256xf32, #tpu.memory_space<vmem>>, vector<1x1x256xf32>
    %9 = vector.shape_cast %8 : vector<1x1x256xf32> to vector<1x256xf32>
    %10 = vector.broadcast %9 : vector<1x256xf32> to vector<8x256xf32>
    %11 = arith.addf %7, %10 : vector<8x256xf32>
    %12 = vector.extract_strided_slice %11 {offsets = [0, 0], sizes = [8, 128], strides = [1, 1]} : vector<8x256xf32> to vector<8x128xf32>
    %c0_10 = arith.constant 0 : index
    %c0_11 = arith.constant 0 : index
    %13 = vector.load %arg11[%c0_10, %c0_11] : memref<8x128xf32, #tpu.memory_space<vmem>>, vector<8x128xf32>
    tpu.vector_store %arg11[%c0_10, %c0_11], %12 {strides = array<i32>} : memref<8x128xf32, #tpu.memory_space<vmem>>, vector<8x128xf32>,
    %14 = vector.extract_strided_slice %11 {offsets = [0, 128], sizes = [8, 128], strides = [1, 1]} : vector<8x256xf32> to vector<8x128xf32>
    %c0_12 = arith.constant 0 : index
    %c0_13 = arith.constant 0 : index
    %15 = vector.load %arg12[%c0_12, %c0_13] : memref<8x128xf32, #tpu.memory_space<vmem>>, vector<8x128xf32>
    tpu.vector_store %arg12[%c0_12, %c0_13], %14 {strides = array<i32>} : memref<8x128xf32, #tpu.memory_space<vmem>>, vector<8x128xf32>,
    %c0_14 = arith.constant 0 : index
    %c0_15 = arith.constant 0 : index
    %c0_16 = arith.constant 0 : index
    %16 = vector.load %arg6[%c0_14, %c0_15, %c0_16] : memref<1x8x128xf32, #tpu.memory_space<vmem>>, vector<1x1x128xf32>
    %17 = vector.shape_cast %16 : vector<1x1x128xf32> to vector<1x128xf32>
    %c0_17 = arith.constant 0 : index
    %c0_18 = arith.constant 0 : index
    %c0_19 = arith.constant 0 : index
    %18 = vector.load %arg7[%c0_17, %c0_18, %c0_19] : memref<1x8x128xf32, #tpu.memory_space<vmem>>, vector<1x1x128xf32>
    %19 = vector.shape_cast %18 : vector<1x1x128xf32> to vector<1x128xf32>
    %c0_20 = arith.constant 0 : index
    %c0_21 = arith.constant 0 : index
    %20 = vector.load %arg13[%c0_20, %c0_21] : memref<1x128xf32, #tpu.memory_space<vmem>>, vector<1x128xf32>
    %c0_22 = arith.constant 0 : index
    %c0_23 = arith.constant 0 : index
    %21 = vector.load %arg14[%c0_22, %c0_23] : memref<1x128xf32, #tpu.memory_space<vmem>>, vector<1x128xf32>
    %c0_24 = arith.constant 0 : index
    %c0_25 = arith.constant 0 : index
    %22 = vector.load %arg11[%c0_24, %c0_25] : memref<8x128xf32, #tpu.memory_space<vmem>>, vector<1x128xf32>
    %c0_26 = arith.constant 0 : index
    %c0_27 = arith.constant 0 : index
    %23 = vector.load %arg12[%c0_26, %c0_27] : memref<8x128xf32, #tpu.memory_space<vmem>>, vector<1x128xf32>
    %24 = arith.mulf %17, %20 : vector<1x128xf32>
    %25 = arith.addf %22, %24 : vector<1x128xf32>
    %26 = arith.mulf %19, %21 : vector<1x128xf32>
    %27 = arith.subf %25, %26 : vector<1x128xf32>
    %c0_28 = arith.constant 0 : index
    %c0_29 = arith.constant 0 : index
    %28 = vector.load %arg11[%c0_28, %c0_29] : memref<8x128xf32, #tpu.memory_space<vmem>>, vector<1x128xf32>
    tpu.vector_store %arg11[%c0_28, %c0_29], %27 {strides = array<i32>} : memref<8x128xf32, #tpu.memory_space<vmem>>, vector<1x128xf32>,
    %29 = arith.mulf %17, %21 : vector<1x128xf32>
    %30 = arith.addf %23, %29 : vector<1x128xf32>
    %31 = arith.mulf %19, %20 : vector<1x128xf32>
    %32 = arith.addf %30, %31 : vector<1x128xf32>
    %c0_30 = arith.constant 0 : index
    %c0_31 = arith.constant 0 : index
    %33 = vector.load %arg12[%c0_30, %c0_31] : memref<8x128xf32, #tpu.memory_space<vmem>>, vector<1x128xf32>
    tpu.vector_store %arg12[%c0_30, %c0_31], %32 {strides = array<i32>} : memref<8x128xf32, #tpu.memory_space<vmem>>, vector<1x128xf32>,
    %c0_32 = arith.constant 0 : index
    %c0_33 = arith.constant 0 : index
    %c0_34 = arith.constant 0 : index
    %34 = vector.load %arg6[%c0_32, %c0_33, %c0_34] : memref<1x8x128xf32, #tpu.memory_space<vmem>>, vector<1x1x128xf32>
    %35 = vector.shape_cast %34 : vector<1x1x128xf32> to vector<1x128xf32>
    %c0_35 = arith.constant 0 : index
    %c0_36 = arith.constant 0 : index
    %c0_37 = arith.constant 0 : index
    %36 = vector.load %arg7[%c0_35, %c0_36, %c0_37] : memref<1x8x128xf32, #tpu.memory_space<vmem>>, vector<1x1x128xf32>
    %37 = vector.shape_cast %36 : vector<1x1x128xf32> to vector<1x128xf32>
    %c0_38 = arith.constant 0 : index
    %c0_39 = arith.constant 0 : index
    %38 = vector.load %arg11[%c0_38, %c0_39] : memref<8x128xf32, #tpu.memory_space<vmem>>, vector<7x128xf32>
    %c0_40 = arith.constant 0 : index
    %c0_41 = arith.constant 0 : index
    %39 = vector.load %arg12[%c0_40, %c0_41] : memref<8x128xf32, #tpu.memory_space<vmem>>, vector<7x128xf32>
    %c1 = arith.constant 1 : index
    %c0_42 = arith.constant 0 : index
    %40 = vector.load %arg11[%c1, %c0_42] : memref<8x128xf32, #tpu.memory_space<vmem>>, vector<7x128xf32>
    %c1_43 = arith.constant 1 : index
    %c0_44 = arith.constant 0 : index
    %41 = vector.load %arg12[%c1_43, %c0_44] : memref<8x128xf32, #tpu.memory_space<vmem>>, vector<7x128xf32>
    %42 = vector.broadcast %35 : vector<1x128xf32> to vector<7x128xf32>
    %43 = arith.mulf %42, %38 : vector<7x128xf32>
    %44 = arith.addf %40, %43 : vector<7x128xf32>
    %45 = vector.broadcast %37 : vector<1x128xf32> to vector<7x128xf32>
    %46 = arith.mulf %45, %39 : vector<7x128xf32>
    %47 = arith.subf %44, %46 : vector<7x128xf32>
    %c1_45 = arith.constant 1 : index
    %c0_46 = arith.constant 0 : index
    %48 = vector.load %arg11[%c1_45, %c0_46] : memref<8x128xf32, #tpu.memory_space<vmem>>, vector<7x128xf32>
    tpu.vector_store %arg11[%c1_45, %c0_46], %47 {strides = array<i32>} : memref<8x128xf32, #tpu.memory_space<vmem>>, vector<7x128xf32>,
    %49 = vector.broadcast %35 : vector<1x128xf32> to vector<7x128xf32>
    %50 = arith.mulf %49, %39 : vector<7x128xf32>
    %51 = arith.addf %41, %50 : vector<7x128xf32>
    %52 = vector.broadcast %37 : vector<1x128xf32> to vector<7x128xf32>
    %53 = arith.mulf %52, %38 : vector<7x128xf32>
    %54 = arith.addf %51, %53 : vector<7x128xf32>
    %c1_47 = arith.constant 1 : index
    %c0_48 = arith.constant 0 : index
    %55 = vector.load %arg12[%c1_47, %c0_48] : memref<8x128xf32, #tpu.memory_space<vmem>>, vector<7x128xf32>
    tpu.vector_store %arg12[%c1_47, %c0_48], %54 {strides = array<i32>} : memref<8x128xf32, #tpu.memory_space<vmem>>, vector<7x128xf32>,
    %c0_49 = arith.constant 0 : index
    %c1_50 = arith.constant 1 : index
    %c0_51 = arith.constant 0 : index
    %56 = vector.load %arg6[%c0_49, %c1_50, %c0_51] : memref<1x8x128xf32, #tpu.memory_space<vmem>>, vector<1x1x128xf32>
    %57 = vector.shape_cast %56 : vector<1x1x128xf32> to vector<1x128xf32>
    %c0_52 = arith.constant 0 : index
    %c1_53 = arith.constant 1 : index
    %c0_54 = arith.constant 0 : index
    %58 = vector.load %arg7[%c0_52, %c1_53, %c0_54] : memref<1x8x128xf32, #tpu.memory_space<vmem>>, vector<1x1x128xf32>
    %59 = vector.shape_cast %58 : vector<1x1x128xf32> to vector<1x128xf32>
    %c0_55 = arith.constant 0 : index
    %c0_56 = arith.constant 0 : index
    %60 = vector.load %arg11[%c0_55, %c0_56] : memref<8x128xf32, #tpu.memory_space<vmem>>, vector<6x128xf32>
    %c0_57 = arith.constant 0 : index
    %c0_58 = arith.constant 0 : index
    %61 = vector.load %arg12[%c0_57, %c0_58] : memref<8x128xf32, #tpu.memory_space<vmem>>, vector<6x128xf32>
    %c2 = arith.constant 2 : index
    %c0_59 = arith.constant 0 : index
    %62 = vector.load %arg11[%c2, %c0_59] : memref<8x128xf32, #tpu.memory_space<vmem>>, vector<6x128xf32>
    %c2_60 = arith.constant 2 : index
    %c0_61 = arith.constant 0 : index
    %63 = vector.load %arg12[%c2_60, %c0_61] : memref<8x128xf32, #tpu.memory_space<vmem>>, vector<6x128xf32>
    %64 = vector.broadcast %57 : vector<1x128xf32> to vector<6x128xf32>
    %65 = arith.mulf %64, %60 : vector<6x128xf32>
    %66 = arith.addf %62, %65 : vector<6x128xf32>
    %67 = vector.broadcast %59 : vector<1x128xf32> to vector<6x128xf32>
    %68 = arith.mulf %67, %61 : vector<6x128xf32>
    %69 = arith.subf %66, %68 : vector<6x128xf32>
    %c2_62 = arith.constant 2 : index
    %c0_63 = arith.constant 0 : index
    %70 = vector.load %arg11[%c2_62, %c0_63] : memref<8x128xf32, #tpu.memory_space<vmem>>, vector<6x128xf32>
    tpu.vector_store %arg11[%c2_62, %c0_63], %69 {strides = array<i32>} : memref<8x128xf32, #tpu.memory_space<vmem>>, vector<6x128xf32>,
    %71 = vector.broadcast %57 : vector<1x128xf32> to vector<6x128xf32>
    %72 = arith.mulf %71, %61 : vector<6x128xf32>
    %73 = arith.addf %63, %72 : vector<6x128xf32>
    %74 = vector.broadcast %59 : vector<1x128xf32> to vector<6x128xf32>
    %75 = arith.mulf %74, %60 : vector<6x128xf32>
    %76 = arith.addf %73, %75 : vector<6x128xf32>
    %c2_64 = arith.constant 2 : index
    %c0_65 = arith.constant 0 : index
    %77 = vector.load %arg12[%c2_64, %c0_65] : memref<8x128xf32, #tpu.memory_space<vmem>>, vector<6x128xf32>
    tpu.vector_store %arg12[%c2_64, %c0_65], %76 {strides = array<i32>} : memref<8x128xf32, #tpu.memory_space<vmem>>, vector<6x128xf32>,
    %c0_66 = arith.constant 0 : index
    %c2_67 = arith.constant 2 : index
    %c0_68 = arith.constant 0 : index
    %78 = vector.load %arg6[%c0_66, %c2_67, %c0_68] : memref<1x8x128xf32, #tpu.memory_space<vmem>>, vector<1x1x128xf32>
    %79 = vector.shape_cast %78 : vector<1x1x128xf32> to vector<1x128xf32>
    %c0_69 = arith.constant 0 : index
    %c2_70 = arith.constant 2 : index
    %c0_71 = arith.constant 0 : index
    %80 = vector.load %arg7[%c0_69, %c2_70, %c0_71] : memref<1x8x128xf32, #tpu.memory_space<vmem>>, vector<1x1x128xf32>
    %81 = vector.shape_cast %80 : vector<1x1x128xf32> to vector<1x128xf32>
    %c0_72 = arith.constant 0 : index
    %c0_73 = arith.constant 0 : index
    %82 = vector.load %arg11[%c0_72, %c0_73] : memref<8x128xf32, #tpu.memory_space<vmem>>, vector<4x128xf32>
    %c0_74 = arith.constant 0 : index
    %c0_75 = arith.constant 0 : index
    %83 = vector.load %arg12[%c0_74, %c0_75] : memref<8x128xf32, #tpu.memory_space<vmem>>, vector<4x128xf32>
    %c4 = arith.constant 4 : index
    %c0_76 = arith.constant 0 : index
    %84 = vector.load %arg11[%c4, %c0_76] : memref<8x128xf32, #tpu.memory_space<vmem>>, vector<4x128xf32>
    %c4_77 = arith.constant 4 : index
    %c0_78 = arith.constant 0 : index
    %85 = vector.load %arg12[%c4_77, %c0_78] : memref<8x128xf32, #tpu.memory_space<vmem>>, vector<4x128xf32>
    %86 = vector.broadcast %79 : vector<1x128xf32> to vector<4x128xf32>
    %87 = arith.mulf %86, %82 : vector<4x128xf32>
    %88 = arith.addf %84, %87 : vector<4x128xf32>
    %89 = vector.broadcast %81 : vector<1x128xf32> to vector<4x128xf32>
    %90 = arith.mulf %89, %83 : vector<4x128xf32>
    %91 = arith.subf %88, %90 : vector<4x128xf32>
    %c4_79 = arith.constant 4 : index
    %c0_80 = arith.constant 0 : index
    %92 = vector.load %arg11[%c4_79, %c0_80] : memref<8x128xf32, #tpu.memory_space<vmem>>, vector<4x128xf32>
    tpu.vector_store %arg11[%c4_79, %c0_80], %91 {strides = array<i32>} : memref<8x128xf32, #tpu.memory_space<vmem>>, vector<4x128xf32>,
    %93 = vector.broadcast %79 : vector<1x128xf32> to vector<4x128xf32>
    %94 = arith.mulf %93, %83 : vector<4x128xf32>
    %95 = arith.addf %85, %94 : vector<4x128xf32>
    %96 = vector.broadcast %81 : vector<1x128xf32> to vector<4x128xf32>
    %97 = arith.mulf %96, %82 : vector<4x128xf32>
    %98 = arith.addf %95, %97 : vector<4x128xf32>
    %c4_81 = arith.constant 4 : index
    %c0_82 = arith.constant 0 : index
    %99 = vector.load %arg12[%c4_81, %c0_82] : memref<8x128xf32, #tpu.memory_space<vmem>>, vector<4x128xf32>
    tpu.vector_store %arg12[%c4_81, %c0_82], %98 {strides = array<i32>} : memref<8x128xf32, #tpu.memory_space<vmem>>, vector<4x128xf32>,
    %c7 = arith.constant 7 : index
    %c0_83 = arith.constant 0 : index
    %100 = vector.load %arg11[%c7, %c0_83] : memref<8x128xf32, #tpu.memory_space<vmem>>, vector<1x128xf32>
    %c0_84 = arith.constant 0 : index
    %c0_85 = arith.constant 0 : index
    %101 = vector.load %arg13[%c0_84, %c0_85] : memref<1x128xf32, #tpu.memory_space<vmem>>, vector<1x128xf32>
    tpu.vector_store %arg13[%c0_84, %c0_85], %100 {strides = array<i32>} : memref<1x128xf32, #tpu.memory_space<vmem>>, vector<1x128xf32>,
    %c7_86 = arith.constant 7 : index
    %c0_87 = arith.constant 0 : index
    %102 = vector.load %arg12[%c7_86, %c0_87] : memref<8x128xf32, #tpu.memory_space<vmem>>, vector<1x128xf32>
    %c0_88 = arith.constant 0 : index
    %c0_89 = arith.constant 0 : index
    %103 = vector.load %arg14[%c0_88, %c0_89] : memref<1x128xf32, #tpu.memory_space<vmem>>, vector<1x128xf32>
    tpu.vector_store %arg14[%c0_88, %c0_89], %102 {strides = array<i32>} : memref<1x128xf32, #tpu.memory_space<vmem>>, vector<1x128xf32>,
    %c0_90 = arith.constant 0 : index
    %c0_91 = arith.constant 0 : index
    %104 = vector.load %arg11[%c0_90, %c0_91] : memref<8x128xf32, #tpu.memory_space<vmem>>, vector<8x128xf32>
    %105 = arith.truncf %104 : vector<8x128xf32> to vector<8x128xbf16>
    %c0_92 = arith.constant 0 : index
    %c0_93 = arith.constant 0 : index
    %106 = vector.load %arg12[%c0_92, %c0_93] : memref<8x128xf32, #tpu.memory_space<vmem>>, vector<8x128xf32>
    %107 = arith.truncf %106 : vector<8x128xf32> to vector<8x128xbf16>
    %c0_94 = arith.constant 0 : index
    %c0_95 = arith.constant 0 : index
    %c0_96 = arith.constant 0 : index
    %108 = vector.load %arg8[%c0_94, %c0_95, %c0_96] : memref<1x256x128xbf16, #tpu.memory_space<vmem>>, vector<1x128x128xbf16>
    %109 = vector.shape_cast %108 : vector<1x128x128xbf16> to vector<128x128xbf16>
    %cst_97 = arith.constant dense<0.000000e+00> : vector<8x128xf32>
    %110 = tpu.matmul %105, %109, %cst_97 {dimension_numbers = #tpu.dot_dimension_numbers<[1], [0], [0], [1], [0, 0, 1, 1], [], []>} : vector<8x128xbf16>, vector<128x128xbf16>, vector<8x128xf32> -> vector<8x128xf32>
    %c0_98 = arith.constant 0 : index
    %c128 = arith.constant 128 : index
    %c0_99 = arith.constant 0 : index
    %111 = vector.load %arg8[%c0_98, %c128, %c0_99] : memref<1x256x128xbf16, #tpu.memory_space<vmem>>, vector<1x128x128xbf16>
    %112 = vector.shape_cast %111 : vector<1x128x128xbf16> to vector<128x128xbf16>
    %cst_100 = arith.constant dense<0.000000e+00> : vector<8x128xf32>
    %113 = tpu.matmul %107, %112, %cst_100 {dimension_numbers = #tpu.dot_dimension_numbers<[1], [0], [0], [1], [0, 0, 1, 1], [], []>} : vector<8x128xbf16>, vector<128x128xbf16>, vector<8x128xf32> -> vector<8x128xf32>
    %114 = arith.addf %110, %113 : vector<8x128xf32>
    %c0_101 = arith.constant 0 : index
    %c0_102 = arith.constant 0 : index
    %c0_103 = arith.constant 0 : index
    %115 = vector.load %arg9[%c0_101, %c0_102, %c0_103] : memref<1x1x128xf32, #tpu.memory_space<vmem>>, vector<1x1x128xf32>
    %116 = vector.shape_cast %115 : vector<1x1x128xf32> to vector<1x128xf32>
    %117 = vector.broadcast %116 : vector<1x128xf32> to vector<8x128xf32>
    %118 = arith.addf %114, %117 : vector<8x128xf32>
    %cst_104 = arith.constant 0.000000e+00 : f32
    %119 = vector.broadcast %cst_104 : f32 to vector<8x128xf32>
    %120 = arith.maximumf %118, %119 : vector<8x128xf32>
    %121 = arith.truncf %120 : vector<8x128xf32> to vector<8x128xbf16>
    %c0_105 = arith.constant 0 : index
    %c0_106 = arith.constant 0 : index
    %c0_107 = arith.constant 0 : index
    %c0_108 = arith.constant 0 : index
    %122 = vector.load %arg10[%c0_105, %c0_106, %c0_107, %c0_108] : memref<1x1x8x128xbf16, #tpu.memory_space<vmem>>, vector<1x1x8x128xbf16>
    %123 = vector.shape_cast %122 : vector<1x1x8x128xbf16> to vector<8x128xbf16>
    %124 = vector.shape_cast %121 : vector<8x128xbf16> to vector<1x1x8x128xbf16>
    tpu.vector_store %arg10[%c0_105, %c0_106, %c0_107, %c0_108], %124 {strides = array<i32>} : memref<1x1x8x128xbf16, #tpu.memory_space<vmem>>, vector<1x1x8x128xbf16>,
    return
  }
  func.func @transform_0(%arg0: i32, %arg1: i32, %arg2: i32) -> (i32, i32, i32, i32) {
    %c0_i32 = arith.constant 0 : i32
    %c0_i32_0 = arith.constant 0 : i32
    return %arg0, %arg1, %arg2, %c0_i32 : i32, i32, i32, i32
  }
  func.func @transform_1(%arg0: i32, %arg1: i32, %arg2: i32) -> (i32, i32, i32) {
    %c0_i32 = arith.constant 0 : i32
    %c0_i32_0 = arith.constant 0 : i32
    %c0_i32_1 = arith.constant 0 : i32
    return %arg0, %c0_i32, %c0_i32_0 : i32, i32, i32
  }
  func.func @transform_2(%arg0: i32, %arg1: i32, %arg2: i32) -> (i32, i32, i32) {
    %c0_i32 = arith.constant 0 : i32
    %c0_i32_0 = arith.constant 0 : i32
    %c0_i32_1 = arith.constant 0 : i32
    return %arg0, %c0_i32, %c0_i32_0 : i32, i32, i32
  }
  func.func @transform_3(%arg0: i32, %arg1: i32, %arg2: i32) -> (i32, i32, i32) {
    %c0_i32 = arith.constant 0 : i32
    %c0_i32_0 = arith.constant 0 : i32
    %c0_i32_1 = arith.constant 0 : i32
    return %arg0, %c0_i32, %c0_i32_0 : i32, i32, i32
  }
  func.func @transform_4(%arg0: i32, %arg1: i32, %arg2: i32) -> (i32, i32, i32) {
    %c0_i32 = arith.constant 0 : i32
    %c0_i32_0 = arith.constant 0 : i32
    %c0_i32_1 = arith.constant 0 : i32
    return %arg0, %c0_i32, %c0_i32_0 : i32, i32, i32
  }
  func.func @transform_5(%arg0: i32, %arg1: i32, %arg2: i32) -> (i32, i32, i32) {
    %c0_i32 = arith.constant 0 : i32
    %c0_i32_0 = arith.constant 0 : i32
    %c0_i32_1 = arith.constant 0 : i32
    return %arg0, %c0_i32, %c0_i32_0 : i32, i32, i32
  }
  func.func @transform_6(%arg0: i32, %arg1: i32, %arg2: i32) -> (i32, i32, i32) {
    %c0_i32 = arith.constant 0 : i32
    %c0_i32_0 = arith.constant 0 : i32
    %c0_i32_1 = arith.constant 0 : i32
    return %arg0, %c0_i32, %c0_i32_0 : i32, i32, i32
  }
  func.func @transform_7(%arg0: i32, %arg1: i32, %arg2: i32) -> (i32, i32, i32, i32) {
    %c0_i32 = arith.constant 0 : i32
    %c0_i32_0 = arith.constant 0 : i32
    return %arg0, %arg1, %arg2, %c0_i32 : i32, i32, i32, i32
  }
}

</mosaic_0001>

<bundles_post_ra>
// kernel: tpu_custom_call.1
= control target key start
LH: loop header
LB: loop body
LE: loop exit
PB: predicated region body
PF: predicated region fallthrough
CT: control target
= control target key end

     0   :  { %s2284_s0 = inlined_call_operand.hbm [shape: bf16[2,2,8,128], index: 0, kind: input, shape index: {}]   ;;  %s2285_s1 = inlined_call_operand.hbm [shape: bf16[2,128,256], index: 1, kind: input, shape index: {}]   ;;  %s2286_s2 = inlined_call_operand.hbm [shape: f32[2,1,256], index: 2, kind: input, shape index: {}]   ;;  %s2287_s3 = inlined_call_operand.hbm [shape: f32[2,8,128], index: 3, kind: input, shape index: {}]   ;;  %s2288_s4 = inlined_call_operand.hbm [shape: f32[2,8,128], index: 4, kind: input, shape index: {}]   ;;  %s2289_s5 = inlined_call_operand.hbm [shape: bf16[2,256,128], index: 5, kind: input, shape index: {}]   ;;  %s2290_s6 = inlined_call_operand.vmem [shape: f32[2,1,128], index: 6, kind: input, shape index: {}]   ;;  %s2291_s7 = inlined_call_operand.hbm [shape: bf16[2,2,8,128], index: 7, kind: output, shape index: {}]  }
   0x1   :  { %2309 = sst [smem:[#allocation34_spill]] %s2284_s0 }
   0x2   :  { %2310 = sst [smem:[#allocation35_spill]] %s2285_s1 }
   0x3   :  { %2311 = sst [smem:[#allocation36_spill]] %s2287_s3 }
   0x4   :  { %2312 = sst [smem:[#allocation37_spill]] %s2288_s4 }
   0x5   :  { %2313 = sst [smem:[#allocation38_spill]] %s2289_s5 }
   0x6   :  { %2314 = sst [smem:[#allocation39_spill]] %s2290_s6 }
   0x7   :  { %2315 = sst [smem:[#allocation40_spill]] %s2291_s7 }
   0x8   :  { %12 = vsyncpa [#allocation7], 0 }
   0x9   :  { %14 = vsyncpa [#allocation7 + $0x1], 0 }
   0xa   :  { %15 = vsyncpa [#allocation10], 0 }
   0xb   :  { %17 = vsyncpa [#allocation10 + $0x1], 0 }
   0xc   :  { %18 = vsyncpa [#allocation13], 0 }
   0xd   :  { %20 = vsyncpa [#allocation13 + $0x1], 0 }
   0xe   :  { %21 = vsyncpa [#allocation16], 0 }
   0xf   :  { %23 = vsyncpa [#allocation16 + $0x1], 0 }
  0x10   :  { %24 = vsyncpa [#allocation8], 0 }
  0x11   :  { %26 = vsyncpa [#allocation8 + $0x1], 0  ;;  %s1886_s24 = smov 0   ;;  %s1888_s25 = smov 0  }
  0x12   :  { %s1890_s26 = smov 0   ;;  %s1892_s27 = smov 0  }
  0x13   :  { %s1894_s28 = smov 0   ;;  %s1896_s29 = smov 0  }
  0x14   :  { %s1898_s30 = smov 0   ;;  %s1900_s8 = smov 0  }
  0x15   :  { %s1902_s9 = smov 0   ;;  %s1904_s10 = smov 0  }
  0x16   :  { %s1906_s11 = smov 0  }
  0x17 LB: > { %2316 = sst [smem:[#allocation23_spill]] %s1794_s25  ;;  %p70_p0 = scmp.eq.s32.totalorder %s1830_s11, 0  ;;  %s1830_s11 = sphi %s1906_s11, %s32_s11   ;;  %s1826_s10 = sphi %s1904_s10, %s2369_s10   ;;  %s1822_s9 = sphi %s1902_s9, %s2368_s9   ;;  %s1818_s8 = sphi %s1900_s8, %s2367_s8   ;;  %s1814_s30 = sphi %s1898_s30, %s2366_s30   ;;  %s1810_s29 = sphi %s1896_s29, %s2359_s29   ;;  %s1806_s28 = sphi %s1894_s28, %s2365_s28   ;;  %s1802_s27 = sphi %s1892_s27, %s2364_s27   ;;  %s1798_s26 = sphi %s1890_s26, %s2363_s26   ;;  %s1794_s25 = sphi %s1888_s25, %s2362_s25   ;;  %s1790_s24 = sphi %s1886_s24, %s2356_s24  }
  0x18   : > { %2317 = sst [smem:[#allocation24_spill]] %s1810_s29  ;;  %p95_p1 = scmp.ne.s32.totalorder %s1798_s26, %s1794_s25 }
  0x19   : > { %2318 = sst [smem:[#allocation25_spill]] %s1814_s30  ;;  %p2298_p2 = scmp.lt.s32.totalorder %s1830_s11, 4 }
  0x1a   : > { %2319 = sst [smem:[#allocation26_spill]] %s1818_s8  ;;  %p97_p3 = por %p95_p1, %p70_p0 }
  0x1b   : > { %s2294_s12 = sand.u32 1, %s1830_s11   ;;  %s1949_s13 = sand.u32 1, %s1798_s26  }
  0x1c   : > { %s2292_s14 = sshll.u32 %s1949_s13, 7  ;;  %s2293_s15 = sshll.u32 %s1826_s10, 11 }
  0x1d   : > { %s2320_s1 = sld [smem:[#allocation35_spill]]  ;;  %s310_s19 = scalar_lea.vmem [#allocation9], %s2292_s14 }
  0x1e   : > { %s317_s20 = sshll.u32 %s310_s19, 4  ;;  %p1962_p4 = pnand %p2298_p2, %p97_p3  ;;  %s318_s20 = int_to_ptr.vmem [resolvable:$true] %s317_s20 }
  0x1f   : > { %s1968_s22 = scalar_lea.sflag [#allocation10], %s2294_s12  ;;  %s1543_s16 = scalar_lea.vmem %s318_s20, 2048 }
  0x20   : > { %p1972_p5 = pneg %p1962_p4  ;;  %p1544_p6 = scmp.ne.s32.totalorder %s318_s20, %s1543_s16 }
  0x21   : > { %s1832_s17 = smov [#allocation9]  }
  0x22   : > { %p1546_p7 = pnand %p1544_p6, %p1972_p5  ;;  %s1548_s19 = sshll.u32 %s1832_s17, 4  ;;  %s1549_s19 = int_to_ptr.vmem [resolvable:$false] %s1548_s19 }
  0x23   : > { %s316_s18 = scalar_lea.hbm %s2320_s1, %s2293_s15  ;;  %s1550_s14 = scalar_lea.vmem %s1549_s19, 4096 }
  0x24   : > { %p1547_p8 = pneg %p1546_p7  ;;  %p1551_p9 = scmp.lt.s32.totalorder %s318_s20, %s1549_s19 }
  0x25   : > { %p1552_p10 = scmp.lt.s32.totalorder %s1550_s14, %s1543_s16 }
  0x27   : > { %p1553_p11 = por %p1552_p10, %p1551_p9 }
  0x29   : > { %p1554_p12 = pnand %p1553_p11, %p1547_p8 }
  0x2b   : > { %1557 = shalt.err (!%p1554_p12)
}
  0x2c   : > { %s1833_s15 = smov 128   ;;  %s1834_s12 = smov 8  }
  0x2d   : > { %1376 = dma.hbm_to_vmem [thread:$0]  (!%p1962_p4), %s316_s18, 2048, %s318_s20, %s1968_s22, %s1833_s15, %s1833_s15, %s1834_s12  }
  0x2e   : > { %p1243_p13 = scmp.ge.s32.totalorder %s1830_s11, 1  ;;  %p407_p1 = scmp.lt.s32.totalorder %s1830_s11, 5 }
  0x2f   : > { %s2297_s17 = sshll.u32 %s1949_s13, 3  ;;  %s1237_s16 = sshll.u32 %s1826_s10, 7 }
  0x30   : > { %p1984_p3 = pnand %p1243_p13, %p407_p1  ;;  %s350_s19 = scalar_lea.vmem [#allocation12], %s2297_s17 }
  0x31   : > { %s357_s1 = sshll.u32 %s350_s19, 4  ;;  %s2324_s3 = sld [smem:[#allocation36_spill]]  ;;  %s358_s1 = int_to_ptr.vmem [resolvable:$true] %s357_s1 }
  0x32   : > { %s2325_s8 = sand.u32 1, %s1830_s11   ;;  %s1571_s12 = scalar_lea.vmem %s358_s1, 128 }
  0x33   : > { %s1996_s5 = scalar_lea.sflag [#allocation13], %s2325_s8  ;;  %p1572_p6 = scmp.ne.s32.totalorder %s358_s1, %s1571_s12 }
  0x34   : > { %s1835_s15 = smov [#allocation12]  }
  0x35   : > { %p1574_p7 = pnand %p1572_p6, %p1972_p5  ;;  %s1576_s18 = sshll.u32 %s1835_s15, 4  ;;  %s1577_s18 = int_to_ptr.vmem [resolvable:$false] %s1576_s18 }
  0x36   : > { %s1578_s20 = scalar_lea.vmem %s1577_s18, 256  ;;  %p1579_p9 = scmp.lt.s32.totalorder %s358_s1, %s1577_s18 }
  0x37   : > { %s355_s30 = scalar_lea.hbm %s2324_s3, %s1237_s16  ;;  %p1575_p8 = pneg %p1574_p7 }
  0x38   : > { %p1580_p10 = scmp.lt.s32.totalorder %s1578_s20, %s1571_s12 }
  0x3a   : > { %p1581_p11 = por %p1580_p10, %p1579_p9 }
  0x3c   : > { %p1582_p12 = pnand %p1581_p11, %p1575_p8 }
  0x3e   : > { %1585 = shalt.err (!%p1582_p12)
}
  0x3f   : > { %1382 = dma.hbm_to_vmem [thread:$0]  (!%p1962_p4), %s355_s30, 128, %s358_s1, %s1996_s5  }
  0x40   : > { %s2326_s4 = sld [smem:[#allocation37_spill]]  ;;  %s2009_s19 = sadd.s32 4294967295, %s1830_s11  }
  0x41   : > { %2327 = sst [smem:[#allocation27_spill]] %s2009_s19  ;;  %s1224_s12 = sadd.s32 4294967294, %s1830_s11  }
  0x42   : > { %s47_s15 = sadd.s32 1, %s1822_s9  ;;  %s51_s18 = sadd.s32 1, %s1826_s10 }
  0x43   : > { %p49_p13 = scmp.ge.s32.totalorder %s47_s15, 2  ;;  %s62_s1 = sadd.s32 1, %s1810_s29 }
  0x44   : > { %p69_p1 = scmp.ne.s32.totalorder %s1810_s29, %s1806_s28  ;;  %p75_p6 = scmp.ne.s32.totalorder %s1806_s28, %s1802_s27 }
  0x45   : > { %s2371_s15 = smov (%p49_p13, %s47_s15), 0  ;;  %s2373_s18 = smov (!%p49_p13, %s51_s18), %s1826_s10 }
  0x46   : > { %s2006_s8 = scalar_lea.hbm %s2326_s4, %s1237_s16  ;;  %2328 = sst [smem:[#allocation28_spill]] %s2371_s15 }
  0x47   : > { %s56_s30 = ssub.s32 %s1822_s9, %s2371_s15  ;;  %p2029_p7 = por %p70_p0, %p69_p1 }
  0x48   : > { %p53_p8 = scmp.ge.s32.totalorder %s2373_s18, 2  ;;  %p76_p9 = scmp.eq.s32.totalorder %s2009_s19, 0 }
  0x49   : > { %s88_s20 = sadd.s32 1, %s1798_s26  ;;  %p101_p10 = scmp.ne.s32.totalorder %s1794_s25, %s1790_s24 }
  0x4a   : > { %s2375_s18 = smov (%p53_p8, %s2373_s18), 0  ;;  %p2042_p11 = por %p76_p9, %p75_p6 }
  0x4b   : > { %2330 = sst [smem:[#allocation29_spill]] %s2375_s18  ;;  %p2046_p0 = por %p101_p10, %p76_p9 }
  0x4c   : > { %s2331_s6 = scalar_select %p2042_p11, 1, 0 }
  0x4d   : > { %s2333_s7 = scalar_select %p2046_p0, 1, 0 }
  0x4e   : > { %2332 = sst [smem:[#allocation30_spill]] %s2331_s6  ;;  %s55_s17 = ssub.s32 %s1826_s10, %s2375_s18 }
  0x4f   : > { %2334 = sst [smem:[#allocation31_spill]] %s2333_s7  ;;  %p259_p12 = scmp.eq.s32.totalorder %s2009_s19, 3 }
  0x50   : > { %s57_s3 = sor.u32 %s56_s30, %s55_s17  ;;  %p86_p13 = scmp.eq.s32.totalorder %s55_s17, 0 }
  0x51   : > { %p60_p2 = scmp.eq.s32.totalorder %s57_s3, 0  ;;  %p2056_p8 = por %p259_p12, %p69_p1 }
  0x52   : > { %s2061_s4 = scalar_select %p86_p13, %s1798_s26, %s88_s20  }
  0x53   : > { %s2335_s24 = scalar_select %p2056_p8, 1, 0 }
  0x54   : > { %2336 = sst [smem:[#allocation32_spill]] %s2061_s4  ;;  %p265_p9 = scmp.eq.s32.totalorder %s1224_s12, 3 }
  0x55   : > { %s2064_s15 = scalar_select %p60_p2, %s1810_s29, %s62_s1  }
  0x56   : > { %s285_s7 = sand.u32 1, %s1810_s29   ;;  %p2070_p10 = por %p265_p9, %p75_p6 }
  0x57   : > { %2337 = sst [smem:[#allocation33_spill]] %s2064_s15  ;;  %s1227_s25 = sshll.u32 %s285_s7, 2 }
  0x58   : > { %s2338_s30 = scalar_select %p2070_p10, 1, 0 }
  0x59   : > { %s1228_s17 = sshll.u32 %s1826_s10, 1  ;;  %s289_s3 = scalar_lea.vmem [#allocation6], %s1227_s25 }
  0x5a   : > { %s299_s18 = sshll.u32 %s289_s3, 4  ;;  %s295_s19 = sadd.s32 %s1822_s9, %s1228_s17  ;;  %s300_s18 = int_to_ptr.vmem [resolvable:$true] %s299_s18 }
  0x5b   : > { %s1229_s6 = sshll.u32 %s295_s19, 6  ;;  %p2339_p1 = scmp.lt.s32.totalorder %s1830_s11, 4 }
  0x5c   : > { %s2341_s0 = sld [smem:[#allocation34_spill]]  ;;  %s1233_s29 = sshll.u32 %s1949_s13, 1 }
  0x5d   : > { %p2080_p12 = pnand %p2339_p1, %p2029_p7  ;;  %s286_s4 = scalar_lea.sflag [#allocation7], %s285_s7 }
  0x5e   : > { %s1599_s25 = scalar_lea.vmem %s300_s18, 64  ;;  %s1836_s19 = smov [#allocation6]  }
  0x5f   : > { %p1588_p2 = pneg %p2080_p12  ;;  %p1600_p6 = scmp.ne.s32.totalorder %s300_s18, %s1599_s25 }
  0x60   : > { %s1604_s16 = sshll.u32 %s1836_s19, 4  ;;  %s1605_s16 = int_to_ptr.vmem [resolvable:$false] %s1604_s16 }
  0x61   : > { %p1602_p13 = pnand %p1600_p6, %p1588_p2  ;;  %s1606_s17 = scalar_lea.vmem %s1605_s16, 128 }
  0x62   : > { %s297_s15 = scalar_lea.hbm %s2341_s0, %s1229_s6  ;;  %p1607_p7 = scmp.lt.s32.totalorder %s300_s18, %s1605_s16 }
  0x63   : > { %p1603_p9 = pneg %p1602_p13  ;;  %p1608_p1 = scmp.lt.s32.totalorder %s1606_s17, %s1599_s25 }
  0x65   : > { %p1609_p10 = por %p1608_p1, %p1607_p7 }
  0x67   : > { %p1610_p8 = pnand %p1609_p10, %p1603_p9 }
  0x69   : > { %1613 = shalt.err (!%p1610_p8)
}
  0x6a   : > { %1373 = dma.hbm_to_vmem [thread:$0]  (!%p2080_p12), %s297_s15, 64, %s300_s18, %s286_s4  }
  0x6b   : > { %s1296_s6 = sshll.u32 %s1826_s10, 5  ;;  %s331_s7 = scalar_lea.vmem [#allocation11], %s1233_s29 }
  0x6c   : > { %s339_s3 = sshll.u32 %s331_s7, 4  ;;  %s337_s0 = scalar_lea.hbm %s2286_s2, %s1296_s6  ;;  %s340_s3 = int_to_ptr.vmem [resolvable:$true] %s339_s3 }
  0x6d   : > { %s1627_s19 = scalar_lea.vmem %s340_s3, 32  ;;  %s1837_s25 = smov [#allocation11]  }
  0x6e   : > { %p1628_p2 = scmp.ne.s32.totalorder %s340_s3, %s1627_s19  ;;  %s1632_s16 = sshll.u32 %s1837_s25, 4  ;;  %s1633_s16 = int_to_ptr.vmem [resolvable:$false] %s1632_s16 }
  0x6f   : > { %s1634_s20 = scalar_lea.vmem %s1633_s16, 64  ;;  %p1635_p8 = scmp.lt.s32.totalorder %s340_s3, %s1633_s16 }
  0x70   : > { %p1630_p6 = pnand %p1628_p2, %p1972_p5  ;;  %p1636_p10 = scmp.lt.s32.totalorder %s1634_s20, %s1627_s19 }
  0x72   : > { %p1631_p13 = pneg %p1630_p6  ;;  %p1637_p12 = por %p1636_p10, %p1635_p8 }
  0x74   : > { %p1638_p9 = pnand %p1637_p12, %p1631_p13 }
  0x76   : > { %1641 = shalt.err (!%p1638_p9)
}
  0x77   : > { %1379 = dma.hbm_to_vmem [thread:$0]  (!%p1962_p4), %s337_s0, 32, %s340_s3, %s1968_s22  }
  0x78   : > { %s2342_s4 = sshll.u32 %s1949_s13, 3  ;;  %s1838_s17 = smov [#allocation14]  }
  0x79   : > { %s368_s29 = scalar_lea.vmem [#allocation14], %s2342_s4  ;;  %s1660_s6 = sshll.u32 %s1838_s17, 4  ;;  %s1661_s6 = int_to_ptr.vmem [resolvable:$false] %s1660_s6 }
  0x7a   : > { %s375_s15 = sshll.u32 %s368_s29, 4  ;;  %s1662_s7 = scalar_lea.vmem %s1661_s6, 256  ;;  %s376_s15 = int_to_ptr.vmem [resolvable:$true] %s375_s15 }
  0x7b   : > { %s1655_s18 = scalar_lea.vmem %s376_s15, 128  ;;  %p1663_p6 = scmp.lt.s32.totalorder %s376_s15, %s1661_s6 }
  0x7c   : > { %p1656_p7 = scmp.ne.s32.totalorder %s376_s15, %s1655_s18  ;;  %p1664_p13 = scmp.lt.s32.totalorder %s1662_s7, %s1655_s18 }
  0x7e   : > { %p1658_p1 = pnand %p1656_p7, %p1972_p5  ;;  %p1665_p8 = por %p1664_p13, %p1663_p6 }
  0x80   : > { %p1659_p2 = pneg %p1658_p1 }
  0x82   : > { %p1666_p10 = pnand %p1665_p8, %p1659_p2 }
  0x84   : > { %1669 = shalt.err (!%p1666_p10)
}
  0x85   : > { %1385 = dma.hbm_to_vmem [thread:$0]  (!%p1962_p4), %s2006_s8, 128, %s376_s15, %s1996_s5  }
  0x86   : > { %s2343_s0 = sshll.u32 %s1826_s10, 11  ;;  %s2344_s12 = sld [smem:[#allocation38_spill]] }
  0x87   : > { %s2345_s19 = sshll.u32 %s1949_s13, 7  ;;  %s383_s20 = scalar_lea.sflag [#allocation16], %s1949_s13 }
  0x88   : > { %s386_s25 = scalar_lea.vmem [#allocation15], %s2345_s19  ;;  %s1839_s29 = smov [#allocation15]  }
  0x89   : > { %s393_s16 = sshll.u32 %s386_s25, 4  ;;  %s1688_s18 = sshll.u32 %s1839_s29, 4  ;;  %s394_s16 = int_to_ptr.vmem [resolvable:$true] %s393_s16  ;;  %s1689_s18 = int_to_ptr.vmem [resolvable:$false] %s1688_s18 }
  0x8a   : > { %s1683_s4 = scalar_lea.vmem %s394_s16, 2048  ;;  %s1690_s17 = scalar_lea.vmem %s1689_s18, 4096 }
  0x8b   : > { %p1684_p12 = scmp.ne.s32.totalorder %s394_s16, %s1683_s4  ;;  %p1691_p1 = scmp.lt.s32.totalorder %s394_s16, %s1689_s18 }
  0x8c   : > { %s392_s1 = scalar_lea.hbm %s2344_s12, %s2343_s0  ;;  %p1692_p2 = scmp.lt.s32.totalorder %s1690_s17, %s1683_s4 }
  0x8d   : > { %p1686_p9 = pnand %p1684_p12, %p1972_p5 }
  0x8e   : > { %p1693_p6 = por %p1692_p2, %p1691_p1 }
  0x8f   : > { %p1687_p7 = pneg %p1686_p9 }
  0x91   : > { %p1694_p13 = pnand %p1693_p6, %p1687_p7 }
  0x93   : > { %1697 = shalt.err (!%p1694_p13)
}
  0x94   : > { %s1840_s5 = smov 64   ;;  %s1841_s8 = smov 4  }
  0x95   : > { %1388 = dma.hbm_to_vmem [thread:$0]  (!%p1962_p4), %s392_s1, 2048, %s394_s16, %s383_s20, %s1840_s5, %s1840_s5, %s1841_s8  }
  0x96   : > { %411 = sbr.rel (%p1984_p3) target bundleno = 684 (0x2ac), region = 48  ;;  %s2124_s23 = sand.u32 (!%p1984_p3), 1, %s1806_s28  }
  0x97   : > { %s1244_s15 = sshll.u32 (!%p1984_p3), %s2124_s23, 2  ;;  %s414_s6 = scalar_lea.sflag (!%p1984_p3), [#allocation7], %s2124_s23 }
  0x98   : > { %s2130_s7 = scalar_lea.vmem (!%p1984_p3), [#allocation6], %s1244_s15 }
  0x9b   : > { %1769 = dma.done.wait (%p2042_p11), %s414_s6, 64  }
  0x9c   : > { %1771 = vsyncadd (%p2042_p11), %s414_s6, 4294967232  ;;  %s2347_s21 = sld [smem:[#allocation27_spill]] }
  0x9d   : > { %s2348_s14 = sld [smem:[#allocation23_spill]] }
  0xa2   : > { %s422_s22 = sand.u32 1, %s2347_s21  }
  0xa3   : > { %s424_s3 = sand.u32 1, %s2348_s14   ;;  %s423_s1 = scalar_lea.sflag [#allocation10], %s422_s22 }
  0xa4   : > { %s1245_s12 = sshll.u32 %s424_s3, 7 }
  0xa5   : > { %s2138_s19 = scalar_lea.vmem [#allocation9], %s1245_s12 }
  0xa6   : > { %1773 = dma.done.wait (%p2046_p0), %s423_s1, 2080  }
  0xa7   : > { %1775 = vsyncadd (%p2046_p0), %s423_s1, 4294965216  ;;  %s1246_s25 = sshll.u32 %s424_s3, 1  ;;  %s1247_s16 = sshll.u32 %s424_s3, 3 }
  0xa8   : > { %s2144_s20 = scalar_lea.vmem [#allocation11], %s1246_s25  ;;  %s441_s4 = scalar_lea.sflag [#allocation13], %s422_s22 }
  0xa9   : > { %s2146_s29 = scalar_lea.vmem [#allocation12], %s1247_s16 }
  0xaa   : > { %1777 = dma.done.wait (%p2046_p0), %s441_s4, 256  }
  0xab   : > { %1779 = vsyncadd (%p2046_p0), %s441_s4, 4294967040  ;;  %s2152_s18 = scalar_lea.vmem [#allocation14], %s1247_s16  ;;  %s459_s17 = scalar_lea.sflag [#allocation16], %s424_s3 }
  0xac   : > { %s2154_s5 = scalar_lea.vmem [#allocation15], %s1245_s12 }
  0xad   : > { %1781 = dma.done.wait (%p2046_p0), %s459_s17, 2048  }
  0xae   : > { %1783 = vsyncadd (%p2046_p0), %s459_s17, 4294965248  ;;  %v1842_v0 = vmov 0   ;;  %v1843_v1 = vmov 0.0   ;;  %v1490_v2 = vld [vmem:[%s2138_s19 + $0x74] ss:$8 sps:$4 sm:$0xff]   ;;  %v1518_v23 = vld [vmem:[%s2154_s5 + $0x28] sm:$0xff]   ;;  %v550_v35 = vlaneseq }
  0xaf   : > { %672 = vmatprep.mubr.bf16.mxu0 %v1842_v0  ;;  %529 = vst [vmem:[#allocation4] sm:$0x1] %v1843_v1  ;;  %530 = vst [vmem:[#allocation5] sm:$0x1] %v1843_v1  ;;  %1316 = vmatprep.subr.bf16.mxu1 %v1843_v1  ;;  %v1492_v3 = vld [vmem:[%s2138_s19 + $0x70] ss:$8 sps:$4 sm:$0xff]  }
  0xb0   : > { %640 = vmatprep.subr.bf16.mxu0 %v1490_v2  ;;  %v1493_v4 = vld [vmem:[%s2138_s19 + $0x64] ss:$8 sps:$4 sm:$0xff]   ;;  %v1495_v5 = vld [vmem:[%s2138_s19 + $0x60] ss:$8 sps:$4 sm:$0xff]   ;;  %v1496_v6 = vld [vmem:[%s2138_s19 + $0x54] ss:$8 sps:$4 sm:$0xff]  }
  0xb1   : > { %641 = vmatpush1.bf16.msra.mxu0 %v1492_v3  ;;  %v1498_v7 = vld [vmem:[%s2138_s19 + $0x50] ss:$8 sps:$4 sm:$0xff]   ;;  %v1499_v8 = vld [vmem:[%s2138_s19 + $0x44] ss:$8 sps:$4 sm:$0xff]   ;;  %v1501_v9 = vld [vmem:[%s2138_s19 + $0x40] ss:$8 sps:$4 sm:$0xff]  }
  0xb2   : > { %642 = vmatprep.subr.bf16.mxu0 %v1493_v4  ;;  %v1502_v10 = vld [vmem:[%s2138_s19 + $0x34] ss:$8 sps:$4 sm:$0xff]   ;;  %v1504_v11 = vld [vmem:[%s2138_s19 + $0x30] ss:$8 sps:$4 sm:$0xff]   ;;  %v1505_v12 = vld [vmem:[%s2138_s19 + $0x24] ss:$8 sps:$4 sm:$0xff]  }
  0xb3   : > { %v1507_v13 = vld [vmem:[%s2138_s19 + $0x20] ss:$8 sps:$4 sm:$0xff]   ;;  %v1508_v14 = vld [vmem:[%s2138_s19 + $0x14] ss:$8 sps:$4 sm:$0xff]   ;;  %v1510_v15 = vld [vmem:[%s2138_s19 + $0x10] ss:$8 sps:$4 sm:$0xff]  }
  0xb4   : > { %v1511_v16 = vld [vmem:[%s2138_s19 + $0x4] ss:$8 sps:$4 sm:$0xff]   ;;  %v1513_v17 = vld [vmem:[%s2138_s19] ss:$8 sps:$4 sm:$0xff]   ;;  %v531_v18 = vld [vmem:[%s2130_s7] sm:$0xf] }
  0xb5   : > { %643 = vmatpush1.bf16.msra.mxu0 %v1495_v5  ;;  %v1514_v19 = vld [vmem:[%s2154_s5 + $0x38] sm:$0xff]   ;;  %v1516_v21 = vld [vmem:[%s2154_s5 + $0x30] sm:$0xff]   ;;  %v1519_v24 = vld [vmem:[%s2154_s5 + $0x68] sm:$0xff]   ;;  %vm1844_vm0 = vmmov 0   ;;  %v551_v36 = vshrl.u32 %v550_v35, 7  ;;  %s2350_s8 = sld [smem:[#allocation26_spill]] }
  0xb6   : > { %644 = vmatprep.subr.bf16.mxu0 %v1496_v6  ;;  %v1515_v20 = vld [vmem:[%s2154_s5 + $0x78] sm:$0xff]   ;;  %v1517_v22 = vld [vmem:[%s2154_s5 + $0x70] sm:$0xff]   ;;  %v1520_v25 = vld [vmem:[%s2154_s5 + $0x20] sm:$0xff]   ;;  %1332 = vmatprep.mubr.msk.bf16.mxu1 %vm1844_vm0, %v1843_v1  ;;  %s2351_s13 = sld [smem:[#allocation25_spill]]  ;;  %s520_s1 = scalar_lea.vmem [#allocation17], %s1244_s15 }
  0xb7   : > { %1317 = vmatpush3.bf16.msra.mxu1 %v1515_v20  ;;  %v1521_v26 = vld [vmem:[%s2154_s5 + $0x60] sm:$0xff]   ;;  %v1522_v27 = vld [vmem:[%s2154_s5 + $0x18] sm:$0xff]   ;;  %v1524_v29 = vld [vmem:[%s2154_s5 + $0x10] sm:$0xff]   ;;  %v552_v37 = vsub.s32 0, %v551_v36  ;;  %v556_v39 = vsub.s32 1, %v551_v36  ;;  %s2352_s14 = sld [smem:[#allocation39_spill]] }
  0xb8   : > { %1318 = vmatprep.subr.bf16.mxu1 %v1843_v1  ;;  %v1523_v28 = vld [vmem:[%s2154_s5 + $0x58] sm:$0xff]   ;;  %v1525_v30 = vld [vmem:[%s2154_s5 + $0x50] sm:$0xff]   ;;  %v1526_v31 = vld [vmem:[%s2154_s5 + $0x8] sm:$0xff]   ;;  %s1015_s19 = sshll.u32 %s520_s1, 4  ;;  %p2354_p3 = scmp.ne.s32.totalorder %s2335_s24, 0  ;;  %s1016_s19 = int_to_ptr.vmem [resolvable:$true] %s1015_s19 }
  0xb9   : > { %645 = vmatpush1.bf16.msra.mxu0 %v1498_v7  ;;  %v1527_v32 = vld [vmem:[%s2154_s5 + $0x48] sm:$0xff]   ;;  %v1528_v33 = vld [vmem:[%s2154_s5] sm:$0xff]   ;;  %v548_v38 = vld [vmem:[%s2144_s20] sm:$0x3]  ;;  %s2353_s20 = sld [smem:[#allocation40_spill]]  ;;  %s1845_s17 = smov [#allocation17]  }
  0xba   : > { %646 = vmatprep.subr.bf16.mxu0 %v1499_v8  ;;  %v1529_v34 = vld [vmem:[%s2154_s5 + $0x40] sm:$0xff]   ;;  %v553_v40 = vrot.slane %v548_v38, %v552_v37  ;;  %v557_v41 = vrot.slane %v548_v38, %v556_v39  ;;  %v685_v47 = vld [vmem:[#allocation4] sm:$0x1]  ;;  %v684_v49 = vld [vmem:[%s2152_s18] sm:$0x1]  ;;  %s1702_s5 = sshll.u32 %s1845_s17, 4  ;;  %s1703_s5 = int_to_ptr.vmem [resolvable:$false] %s1702_s5 }
  0xbb   : > { %1319 = vmatpush3.bf16.msra.mxu1 %v1517_v22  ;;  %v683_v46 = vld [vmem:[%s2146_s29] sm:$0x1]  ;;  %v686_v50 = vld [vmem:[#allocation5] sm:$0x1]  ;;  %v696_v57 = vmul.f32 %v685_v47, %v684_v49  ;;  %p521_p4 = scmp.lt.s32.totalorder %s2350_s8, 1  ;;  %s1291_s22 = sshll.u32 %s2350_s8, 1 }
  0xbc   : > { %1320 = vmatprep.subr.bf16.mxu1 %v1843_v1  ;;  %v689_v52 = vmul.f32 %v685_v47, %v683_v46  ;;  %v691_v53 = vmul.f32 %v686_v50, %v684_v49  ;;  %v694_v54 = vmul.f32 %v686_v50, %v683_v46  ;;  %v1267_v62 = vld [vmem:[%s2146_s29] ss:$0 sm:$0xff]  ;;  %s1011_s3 = sadd.s32 %s2351_s13, %s1291_s22  ;;  %s1704_s15 = scalar_lea.vmem %s1703_s5, 128 }
  0xbd   : > { %647 = vmatpush1.bf16.msra.mxu0 %v1501_v9  ;;  %s522_s6 = scalar_select %p521_p4, %s2350_s8, 1 }
  0xbe   : > { %648 = vmatprep.subr.bf16.mxu0 %v1502_v10  ;;  %s1292_s12 = sshll.u32 %s1011_s3, 6  ;;  %p1705_p8 = scmp.lt.s32.totalorder %s1016_s19, %s1703_s5 }
  0xbf   : > { %1321 = vmatpush3.bf16.msra.mxu1 %v1519_v24  ;;  %s523_s0 = scalar_lea.vmem %s2352_s14, %s522_s6  ;;  %s1013_s4 = scalar_lea.hbm %s2353_s20, %s1292_s12 }
  0xc0   : > { %1322 = vmatprep.subr.bf16.mxu1 %v1843_v1 }
  0xc1   : > { %649 = vmatpush1.bf16.msra.mxu0 %v1504_v11 }
  0xc2   : > { %650 = vmatprep.subr.bf16.mxu0 %v1505_v12  ;;  %v1269_v12 = vld [vmem:[%s2146_s29 + $0x1] ss:$0 sm:$0xff] }
  0xc3   : > { %1323 = vmatpush3.bf16.msra.mxu1 %v1521_v26  ;;  %v1271_v26 = vld [vmem:[%s2146_s29 + $0x2] ss:$0 sm:$0xff]  ;;  %s999_s29 = scalar_lea.sflag [#allocation8], %s2124_s23 }
  0xc4   : > { %1324 = vmatprep.subr.bf16.mxu1 %v1843_v1 }
  0xc5   : > { %651 = vmatpush1.bf16.msra.mxu0 %v1507_v13 }
  0xc6   : > { %652 = vmatprep.subr.bf16.mxu0 %v1508_v14 }
  0xc7   : > { %1325 = vmatpush3.bf16.msra.mxu1 %v1523_v28 }
  0xc8   : > { %1326 = vmatprep.subr.bf16.mxu1 %v1843_v1 }
  0xc9   : > { %653 = vmatpush1.bf16.msra.mxu0 %v1510_v15  ;;  %v1270_v15 = vld [vmem:[%s2152_s18 + $0x1] ss:$0 sm:$0xff] }
  0xca   : > { %654 = vmatprep.subr.bf16.mxu0 %v1511_v16 }
  0xcb   : > { %1327 = vmatpush3.bf16.msra.mxu1 %v1525_v30 }
  0xcc   : > { %1328 = vmatprep.subr.bf16.mxu1 %v1843_v1 }
  0xcd   : > { %655 = vmatpush1.bf16.msra.mxu0 %v1513_v17 }
  0xce   : > { %1336 = vmatprep.subr.bf16.mxu0 %v1843_v1 }
  0xcf   : > { %1329 = vmatpush3.bf16.msra.mxu1 %v1527_v32 }
  0xd0   : > { %673 = vmatmul.mubr.bf16.vlgmr.msra.gmra.mxu0 %v531_v18  ;;  %1330 = vmatprep.subr.bf16.mxu1 %v1843_v1 }
  0xd1   : > { %1337 = vmatpush3.bf16.msra.mxu0 %v1514_v19  ;;  %1352 = vmatprep.mubr.msk.bf16.mxu0 %vm1844_vm0, %v1843_v1 }
  0xd2   : > { %1338 = vmatprep.subr.bf16.mxu0 %v1843_v1 }
  0xd3   : > { %1331 = vmatpush3.bf16.msra.mxu1 %v1529_v34 }
  0xd5   : > { %1339 = vmatpush3.bf16.msra.mxu0 %v1516_v21 }
  0xd6   : > { %1340 = vmatprep.subr.bf16.mxu0 %v1843_v1 }
  0xd9   : > { %1341 = vmatpush3.bf16.msra.mxu0 %v1518_v23 }
  0xda   : > { %1342 = vmatprep.subr.bf16.mxu0 %v1843_v1 }
  0xdd   : > { %1343 = vmatpush3.bf16.msra.mxu0 %v1520_v25 }
  0xde   : > { %1344 = vmatprep.subr.bf16.mxu0 %v1843_v1 }
  0xe1   : > { %1345 = vmatpush3.bf16.msra.mxu0 %v1522_v27 }
  0xe2   : > { %1346 = vmatprep.subr.bf16.mxu0 %v1843_v1 }
  0xe5   : > { %1347 = vmatpush3.bf16.msra.mxu0 %v1524_v29  ;;  %v1272_v29 = vld [vmem:[%s2152_s18 + $0x2] ss:$0 sm:$0xff] }
  0xe6   : > { %1348 = vmatprep.subr.bf16.mxu0 %v1843_v1 }
  0xe9   : > { %1349 = vmatpush3.bf16.msra.mxu0 %v1526_v31 }
  0xea   : > { %1350 = vmatprep.subr.bf16.mxu0 %v1843_v1  ;;  %v1268_v1 = vld [vmem:[%s2152_s18] ss:$0 sm:$0xff]  ;;  %s1698_s18 = scalar_lea.vmem %s1016_s19, 64 }
  0xeb   : > { %p1699_p5 = scmp.ne.s32.totalorder %s1016_s19, %s1698_s18  ;;  %p1706_p10 = scmp.lt.s32.totalorder %s1704_s15, %s1698_s18 }
  0xed   : > { %1351 = vmatpush3.bf16.msra.mxu0 %v1528_v33  ;;  %p1700_p11 = pnand %p1699_p5, %p2354_p3  ;;  %p1707_p12 = por %p1706_p10, %p1705_p8 }
  0xef   : > { %p1701_p0 = pneg %p1700_p11 }
  0xf1   : > { %p1708_p9 = pnand %p1707_p12, %p1701_p0 }
 0x190   : > { %v674_v42 = vpop.f32.mrf.mxu0 }
 0x191   : > { %v675_v43 = vadd.f32 %v674_v42, %v553_v40 }
 0x192   : > { %v676_v44 = vpop.f32.mrf.mxu0 }
 0x193   : > { %681 = vst [vmem:[#allocation2] sm:$0xff] %v675_v43  ;;  %v677_v45 = vadd.f32 %v676_v44, %v557_v41 }
 0x194   : > { %v678_v48 = vpop.f32.mrf.mxu0 }
 0x195   : > { %682 = vst [vmem:[#allocation3] sm:$0xff] %v677_v45  ;;  %v1289_v48 = vld [vmem:[%s523_s0] ss:$0 sm:$0xff] }
 0x196   : > { %v679_v51 = vpop.f32.mrf.mxu0 }
 0x19a   : > { %v687_v55 = vld [vmem:[#allocation2] sm:$0x1]  ;;  %v703_v3 = vld [vmem:[#allocation2 + $0x1] sm:$0x7f] }
 0x19b   : > { %v690_v56 = vadd.f32 %v689_v52, %v687_v55 }
 0x19c   : > { %v688_v58 = vld [vmem:[#allocation3] sm:$0x1]  ;;  %v704_v7 = vld [vmem:[#allocation3 + $0x1] sm:$0x7f] }
 0x19d   : > { %v692_v59 = vsub.f32 %v690_v56, %v691_v53  ;;  %v695_v60 = vadd.f32 %v694_v54, %v688_v58 }
 0x19f   : > { %693 = vst [vmem:[#allocation2] sm:$0x1] %v692_v59  ;;  %v697_v61 = vadd.f32 %v696_v57, %v695_v60 }
 0x1a1   : > { %698 = vst [vmem:[#allocation3] sm:$0x1] %v697_v61 }
 0x1a6   : > { %v701_v63 = vld [vmem:[#allocation2] sm:$0x7f] }
 0x1a7   : > { %v709_v0 = vmul.f32 %v1267_v62, %v701_v63  ;;  %v720_v10 = vmul.f32 %v1268_v1, %v701_v63 }
 0x1a8   : > { %v702_v2 = vld [vmem:[#allocation3] sm:$0x7f] }
 0x1a9   : > { %v710_v4 = vadd.f32 %v709_v0, %v703_v3  ;;  %v715_v5 = vmul.f32 %v1268_v1, %v702_v2  ;;  %v718_v6 = vmul.f32 %v1267_v62, %v702_v2 }
 0x1ab   : > { %v716_v8 = vsub.f32 %v710_v4, %v715_v5  ;;  %v719_v9 = vadd.f32 %v718_v6, %v704_v7 }
 0x1ad   : > { %717 = vst [vmem:[#allocation2 + $0x1] sm:$0x7f] %v716_v8  ;;  %v721_v11 = vadd.f32 %v720_v10, %v719_v9 }
 0x1af   : > { %722 = vst [vmem:[#allocation3 + $0x1] sm:$0x7f] %v721_v11 }
 0x1b4   : > { %v725_v13 = vld [vmem:[#allocation2] sm:$0x3f] }
 0x1b5   : > { %v733_v14 = vmul.f32 %v1269_v12, %v725_v13  ;;  %v727_v17 = vld [vmem:[#allocation2 + $0x2] sm:$0x3f]  ;;  %v744_v24 = vmul.f32 %v1270_v15, %v725_v13 }
 0x1b6   : > { %v726_v16 = vld [vmem:[#allocation3] sm:$0x3f] }
 0x1b7   : > { %v734_v18 = vadd.f32 %v733_v14, %v727_v17  ;;  %v739_v19 = vmul.f32 %v1270_v15, %v726_v16  ;;  %v742_v20 = vmul.f32 %v1269_v12, %v726_v16  ;;  %v728_v21 = vld [vmem:[#allocation3 + $0x2] sm:$0x3f] }
 0x1b9   : > { %v740_v22 = vsub.f32 %v734_v18, %v739_v19  ;;  %v743_v23 = vadd.f32 %v742_v20, %v728_v21 }
 0x1bb   : > { %741 = vst [vmem:[#allocation2 + $0x2] sm:$0x3f] %v740_v22  ;;  %v745_v25 = vadd.f32 %v744_v24, %v743_v23 }
 0x1bd   : > { %746 = vst [vmem:[#allocation3 + $0x2] sm:$0x3f] %v745_v25 }
 0x1c2   : > { %v749_v27 = vld [vmem:[#allocation2] sm:$0xf]  ;;  %v751_v31 = vld [vmem:[#allocation2 + $0x4] sm:$0xf] }
 0x1c3   : > { %v757_v28 = vmul.f32 %v1271_v26, %v749_v27  ;;  %v768_v38 = vmul.f32 %v1272_v29, %v749_v27 }
 0x1c4   : > { %v750_v30 = vld [vmem:[#allocation3] sm:$0xf]  ;;  %v752_v35 = vld [vmem:[#allocation3 + $0x4] sm:$0xf] }
 0x1c5   : > { %v758_v32 = vadd.f32 %v757_v28, %v751_v31  ;;  %v763_v33 = vmul.f32 %v1272_v29, %v750_v30  ;;  %v766_v34 = vmul.f32 %v1271_v26, %v750_v30 }
 0x1c7   : > { %v764_v36 = vsub.f32 %v758_v32, %v763_v33  ;;  %v767_v37 = vadd.f32 %v766_v34, %v752_v35 }
 0x1c9   : > { %v769_v39 = vadd.f32 %v768_v38, %v767_v37  ;;  %765 = vst [vmem:[#allocation2 + $0x4] sm:$0xf] %v764_v36 }
 0x1cb   : > { %770 = vst [vmem:[#allocation3 + $0x4] sm:$0xf] %v769_v39 }
 0x1d0   : > { %v771_v40 = vld [vmem:[#allocation2 + $0x7] sm:$0x1] }
 0x1d1   : > { %v775_v41 = vld [vmem:[#allocation2] sm:$0xff]  ;;  %772 = vst [vmem:[#allocation4] sm:$0x1] %v771_v40 }
 0x1d2   : > { %v776_v42 = vpack.c.bf16 %v775_v41, %v775_v41  ;;  %v773_v43 = vld [vmem:[#allocation3 + $0x7] sm:$0x1] }
 0x1d3   : > { %v777_v44 = vld [vmem:[#allocation3] sm:$0xff]  ;;  %774 = vst [vmem:[#allocation5] sm:$0x1] %v773_v43 }
 0x1d4   : > { %1353 = vmatmul.mubr.bf16.vlgmr.msra.gmra.mxu0 %v776_v42  ;;  %v778_v45 = vpack.c.bf16 %v777_v44, %v777_v44 }
 0x1d6   : > { %1333 = vmatmul.mubr.bf16.vlgmr.msra.gmra.mxu1 %v778_v45 }
 0x294   : > { %v981_v46 = vpop.f32.mrf.mxu0 }
 0x296   : > { %v893_v47 = vpop.f32.mrf.mxu1  ;;  %v1354_v49 = vpop.f32.mrf.mxu0 }
 0x297   : > { %v982_v50 = vadd.f32 %v981_v46, %v893_v47 }
 0x298   : > { %v1334_v51 = vpop.f32.mrf.mxu1  ;;  %v984_v52 = vpop.f32.mrf.mxu0 }
 0x299   : > { %v994_v53 = vadd.f32 %v1289_v48, %v982_v50 }
 0x29a   : > { %v896_v54 = vpop.f32.mrf.mxu1  ;;  %v1355_v55 = vpop.f32.mrf.mxu0 }
 0x29b   : > { %v995_v56 = vmax.f32 %v994_v53, 0.0 }
 0x29c   : > { %v1335_v57 = vpop.f32.mrf.mxu1 }
 0x29d   : > { %v996_v58 = vpack.c.bf16 %v995_v56, %v995_v56 }
 0x29f   : > { %997 = vst [vmem:[%s520_s1] sm:$0xf] %v996_v58 }
 0x2a0   : > { %1711 = shalt.err (!%p1708_p9)
}
 0x2a1   : > { %s1712_s8 = scalar_lea.hbm %s1013_s4, 64  ;;  %s1716_s6 = scalar_lea.hbm %s2353_s20, 256 }
 0x2a2   : > { %p1713_p7 = scmp.ne.s32.totalorder %s1013_s4, %s1712_s8  ;;  %p1717_p6 = scmp.lt.s32.totalorder %s1013_s4, %s2353_s20 }
 0x2a3   : > { %p1718_p13 = scmp.lt.s32.totalorder %s1716_s6, %s1712_s8 }
 0x2a4   : > { %p1714_p1 = pnand %p1713_p7, %p2354_p3 }
 0x2a5   : > { %p1719_p4 = por %p1718_p13, %p1717_p6 }
 0x2a6   : > { %p1715_p2 = pneg %p1714_p1 }
 0x2a8   : > { %p1720_p5 = pnand %p1719_p4, %p1715_p2 }
 0x2aa   : > { %1723 = shalt.err (!%p1720_p5)
}
 0x2ab   : > { %1368 = dma.vmem_to_hbm [thread:$0]  (%p2354_p3), %s1016_s19, 64, %s1013_s4, %s999_s29  }
 0x2ac PF: > { %p1394_p11 = scmp.ge.s32.totalorder %s1830_s11, 2  ;;  %s1027_s14 = sand.u32 1, %s1802_s27  }
 0x2ad   : > { %p2355_p0 = scmp.ne.s32.totalorder %s2338_s30, 0  ;;  %s1028_s0 = scalar_lea.sflag [#allocation8], %s1027_s14 }
 0x2af   : > { %p1390_p8 = pnand %p1394_p11, %p2355_p0 }
 0x2b1   : > { %p1391_p10 = pneg %p1390_p8 }
 0x2b3   : > { %1785 = dma.done.wait (%p1391_p10), %s1028_s0, 64  }
 0x2b4   : > { %1787 = vsyncadd (%p1391_p10), %s1028_s0, 4294967232  ;;  %s32_s11 = sadd.s32 1, %s1830_s11   ;;  %s2356_s24 = sld [smem:[#allocation23_spill]] }
 0x2b5   : > { %p29_p12 = scmp.ge.s32.totalorder %s32_s11, 6   ;;  %s2357_s22 = sld [smem:[#allocation32_spill]] }
 0x2b6   : > { %s2358_s3 = sld [smem:[#allocation24_spill]]  ;;  %s2362_s25 = smov %s1798_s26 }
 0x2b7   : > { %s2359_s29 = sld [smem:[#allocation33_spill]]  ;;  %s2364_s27 = smov %s1806_s28 }
 0x2b8   : > { %s2360_s12 = sld [smem:[#allocation28_spill]]  ;;  %s2366_s30 = smov %s1822_s9 }
 0x2b9   : > { %s2361_s1 = sld [smem:[#allocation29_spill]]  ;;  %s2367_s8 = smov %s1826_s10 }
 0x2bb   : > { %s2363_s26 = smov %s2357_s22  ;;  %31 = sbr.rel (!%p29_p12) target bundleno = 23 (0x17), region = 161 }
 0x2bc   : > { %s2365_s28 = smov %s2358_s3 }
 0x2be   : > { %s2368_s9 = smov %s2360_s12 }
 0x2bf   : > { %s2369_s10 = smov %s2361_s1 }
 0x2c0   :  { %1033 = vsyncpa [#allocation7], 1 }
 0x2c1   :  { %1035 = vsyncpa [#allocation7 + $0x1], 1 }
 0x2c2   :  { %1036 = vsyncpa [#allocation10], 1 }
 0x2c3   :  { %1038 = vsyncpa [#allocation10 + $0x1], 1 }
 0x2c4   :  { %1039 = vsyncpa [#allocation13], 1 }
 0x2c5   :  { %1041 = vsyncpa [#allocation13 + $0x1], 1 }
 0x2c6   :  { %1042 = vsyncpa [#allocation16], 1 }
 0x2c7   :  { %1044 = vsyncpa [#allocation16 + $0x1], 1 }
 0x2c8   :  { %1045 = vsyncpa [#allocation8], 1 }
 0x2c9   :  { %1047 = vsyncpa [#allocation8 + $0x1], 1 }

</bundles_post_ra>
